<compile_context>
chip_gen: v7x
topology: tpu7x:2x2x1
jax: 0.10.0
libtpu: 0.0.40
codegen_flags: <defaults>
</compile_context>

<pallas_src>
import jax
import jax.numpy as jnp
from jax import lax
from jax.experimental import pallas as pl
from jax.experimental.pallas import tpu as pltpu


def ddg_kernel(x_ref, w0_ref, b0_ref, w1_ref, b1_ref, wh_ref, out_ref):
    tb = x_ref.shape[1]
    d_in = x_ref.shape[2]

    # (2, tb, D) bf16 -> (2*tb, D): tb is a multiple of 128, so merging the
    # leading dim into the sublane dim is a tile-aligned (free) relayout.
    x = x_ref[...].reshape(2 * tb, d_in)

    # layer 0: Linear(D -> H) + ReLU   (Dropout == identity in eval mode)
    h = jnp.dot(x, w0_ref[...], preferred_element_type=jnp.float32) + b0_ref[...]
    h = jnp.maximum(h, 0.0)

    # layer 1: Linear(H -> H2) + ReLU
    h = jnp.dot(h.astype(jnp.bfloat16), w1_ref[...],
                preferred_element_type=jnp.float32) + b1_ref[...]
    h = jnp.maximum(h, 0.0)                                           # (2TB, H2) f32

    # Antisymmetrize BEFORE the (linear) head: head bias cancels and the head
    # contraction runs once on the difference.  tb % 8 == 0 -> aligned split.
    diff = h[:tb, :] - h[tb:, :]                                      # (TB, H2) f32

    # Head (with the 1/2 already folded into wh): (1, H2) x (TB, H2)^T
    # -> lane-dense (1, TB) row (q @ k.T pattern), unmasked stores.
    out_ref[...] = lax.dot_general(
        wh_ref[...], diff.astype(jnp.bfloat16),
        dimension_numbers=(((1,), (1,)), ((), ())),
        preferred_element_type=jnp.float32)


def ddg_predictor(xf, xr, params, *, block_b=4096):
    """(head(mlp(xf)) - head(mlp(xr))) / 2 in eval mode. Returns (B, 1) f32."""
    (w0, b0), (w1, b1), (wh, bh) = params
    del bh  # head bias cancels exactly in the antisymmetric difference
    B, D = xf.shape
    H = w0.shape[1]
    H2 = w1.shape[1]

    assert block_b % 128 == 0, "block_b must be a multiple of 128 (lane-dense output)"

    # Batch tile: as large as possible (amortize per-step overhead), but keep
    # n_tiles >= 2 whenever the batch permits so v7x's two TensorCores both get
    # work under dimension_semantics=("parallel",).
    b128 = 128 * pl.cdiv(B, 128)
    tb = min(block_b, b128)
    if b128 >= 256 and tb > b128 // 2:
        tb = 128 * (b128 // 256)          # largest 128-multiple giving >= 2 tiles
    n_tiles = pl.cdiv(b128, tb)
    b_pad = n_tiles * tb

    # Fused stack + bf16 cast + pad: one (2, B_pad, D) bf16 input slab.
    # Single DMA per grid step, half the HBM bytes of two f32 inputs, and no
    # per-step concatenate inside the kernel.
    x = jnp.stack([xf, xr], axis=0).astype(jnp.bfloat16)
    if b_pad != B:
        x = jnp.pad(x, ((0, 0), (0, b_pad - B), (0, 0)))

    # bf16 matmul operands (f32 accumulation in-kernel); biases stay f32.
    w0b = w0.astype(jnp.bfloat16)
    w1b = w1.astype(jnp.bfloat16)
    # Fold the antisymmetric 1/2 into the head weights (one-time constant
    # transform of a 16-element weight, NOT activation prescaling).
    whb = (0.5 * wh).reshape(1, H2).astype(jnp.bfloat16)

    def resident(shape):  # weights/biases: same block every grid step
        return pl.BlockSpec(shape, lambda i: (0,) * len(shape))

    flops = 4 * b_pad * (D * H + H * H2) + 2 * b_pad * H2
    bytes_accessed = (2 * b_pad * D * 2                    # stacked bf16 inputs
                      + b_pad * 4                          # f32 output row
                      + (D * H + H * H2 + H2) * 2          # bf16 weights
                      + (H + H2) * 4)                      # f32 biases

    out = pl.pallas_call(
        ddg_kernel,
        out_shape=jax.ShapeDtypeStruct((1, b_pad), jnp.float32),
        grid=(n_tiles,),
        in_specs=[
            pl.BlockSpec((2, tb, D), lambda i: (0, i, 0)),   # stacked xf/xr tile
            resident((D, H)),                                # w0 (VMEM-resident)
            resident((1, H)),                                # b0
            resident((H, H2)),                               # w1
            resident((1, H2)),                               # b1
            resident((1, H2)),                               # 0.5 * wh row
        ],
        out_specs=pl.BlockSpec((1, tb), lambda i: (0, i)),
        compiler_params=pltpu.CompilerParams(dimension_semantics=("parallel",)),
        cost_estimate=pl.CostEstimate(flops=flops, transcendentals=0,
                                      bytes_accessed=bytes_accessed),
    )(x, w0b, b0, w1b, b1, whb)

    return out.reshape(b_pad, 1)[:B]


def init_params(key, input_dim, hidden_dim, num_hidden):
    """Deterministic PyTorch-style (Kaiming-uniform-ish) init for Linear layers."""
    assert num_hidden == 2, "script is specialized to num_hidden=2"
    dims = [input_dim, hidden_dim, hidden_dim // 2, 1]
    params = []
    for i in range(len(dims) - 1):
        key, kw, kb = jax.random.split(key, 3)
        fan_in, fan_out = dims[i], dims[i + 1]
        bound = 1.0 / jnp.sqrt(fan_in)
        # stored as (in_dim, out_dim) so the math is x @ W + b
        w = jax.random.uniform(kw, (fan_in, fan_out), jnp.float32, -bound, bound)
        b = jax.random.uniform(kb, (1, fan_out), jnp.float32, -bound, bound)
        params.append((w, b))
    return params


def reference(xf, xr, params):
    """Pure-JAX f32 reference of DDGPredictor.forward (eval mode)."""
    (w0, b0), (w1, b1), (wh, bh) = params

    def mlp_head(x):
        h = jnp.maximum(x @ w0 + b0, 0.0)
        h = jnp.maximum(h @ w1 + b1, 0.0)
        return h @ wh + bh

    return (mlp_head(xf) - mlp_head(xr)) / 2.0


if __name__ == "__main__":
    # DDGPredictor(input_dim=32, hidden_dim=32, dropout_rate=0.1, num_hidden=2)
    B, INPUT_DIM, HIDDEN_DIM, NUM_HIDDEN = 256, 32, 32, 2

    key = jax.random.PRNGKey(0)
    kxf, kxr, kp = jax.random.split(key, 3)
    xf = jax.random.normal(kxf, (B, INPUT_DIM), jnp.float32)
    xr = jax.random.normal(kxr, (B, INPUT_DIM), jnp.float32)
    params = init_params(kp, INPUT_DIM, HIDDEN_DIM, NUM_HIDDEN)

    # At B=256 the tb-sizing logic picks tb=128 / 2 grid steps, exercising the
    # pipeline and the ("parallel",) axis (both v7x TensorCores get a tile).
    out = ddg_predictor(xf, xr, params)
    out = jax.block_until_ready(out)

    ref = reference(xf, xr, params)
    assert out.shape == (B, 1)
    # bf16 MXU operands (f32 accumulation) vs pure-f32 reference -> loose tol.
    assert jnp.allclose(out, ref, atol=5e-2, rtol=5e-2), "mismatch vs pure-JAX reference"

    # TODO(synk): training-mode Dropout (stateful PRNG masking) is not implemented;
    # this kernel matches eval-mode forward semantics only.
    print("KERNEL_OK")
</pallas_src>

<mosaic_0001>
module attributes {stable_mosaic.version = 11 : i64} {
  func.func @ddg_kernel(%arg0: i32, %arg1: memref<2x128x32xbf16, #tpu.memory_space<vmem>>, %arg2: memref<32x32xbf16, #tpu.memory_space<vmem>>, %arg3: memref<1x32xf32, #tpu.memory_space<vmem>>, %arg4: memref<32x16xbf16, #tpu.memory_space<vmem>>, %arg5: memref<1x16xf32, #tpu.memory_space<vmem>>, %arg6: memref<1x16xbf16, #tpu.memory_space<vmem>>, %arg7: memref<1x128xf32, #tpu.memory_space<vmem>>) attributes {dimension_semantics = [#tpu.dimension_semantics<parallel>], iteration_bounds = array<i64: 2>, scalar_prefetch = 0 : i64, scratch_operands = 0 : i64, tpu.core_type = #tpu.core_type<tc>, window_params = [{transform_indices = @transform_0, window_bounds = array<i64: 2, 128, 32>}, {pipeline_mode = #tpu.pipeline_mode<synchronous>, transform_indices = @transform_1, window_bounds = array<i64: 32, 32>}, {pipeline_mode = #tpu.pipeline_mode<synchronous>, transform_indices = @transform_2, window_bounds = array<i64: 1, 32>}, {pipeline_mode = #tpu.pipeline_mode<synchronous>, transform_indices = @transform_3, window_bounds = array<i64: 32, 16>}, {pipeline_mode = #tpu.pipeline_mode<synchronous>, transform_indices = @transform_4, window_bounds = array<i64: 1, 16>}, {pipeline_mode = #tpu.pipeline_mode<synchronous>, transform_indices = @transform_5, window_bounds = array<i64: 1, 16>}, {transform_indices = @transform_6, window_bounds = array<i64: 1, 128>}]} {
    %c0 = arith.constant 0 : index
    %c0_0 = arith.constant 0 : index
    %c0_1 = arith.constant 0 : index
    %0 = vector.load %arg1[%c0, %c0_0, %c0_1] : memref<2x128x32xbf16, #tpu.memory_space<vmem>>, vector<2x128x32xbf16>
    %1 = vector.shape_cast %0 : vector<2x128x32xbf16> to vector<256x32xbf16>
    %c0_2 = arith.constant 0 : index
    %c0_3 = arith.constant 0 : index
    %2 = vector.load %arg2[%c0_2, %c0_3] : memref<32x32xbf16, #tpu.memory_space<vmem>>, vector<32x32xbf16>
    %cst = arith.constant dense<0.000000e+00> : vector<256x32xf32>
    %3 = tpu.matmul %1, %2, %cst {dimension_numbers = #tpu.dot_dimension_numbers<[1], [0], [0], [1], [0, 0, 1, 1], [], []>} : vector<256x32xbf16>, vector<32x32xbf16>, vector<256x32xf32> -> vector<256x32xf32>
    %c0_4 = arith.constant 0 : index
    %c0_5 = arith.constant 0 : index
    %4 = vector.load %arg3[%c0_4, %c0_5] : memref<1x32xf32, #tpu.memory_space<vmem>>, vector<1x32xf32>
    %5 = vector.broadcast %4 : vector<1x32xf32> to vector<256x32xf32>
    %6 = arith.addf %3, %5 : vector<256x32xf32>
    %cst_6 = arith.constant 0.000000e+00 : f32
    %7 = vector.broadcast %cst_6 : f32 to vector<256x32xf32>
    %8 = arith.maximumf %6, %7 : vector<256x32xf32>
    %9 = arith.truncf %8 : vector<256x32xf32> to vector<256x32xbf16>
    %c0_7 = arith.constant 0 : index
    %c0_8 = arith.constant 0 : index
    %10 = vector.load %arg4[%c0_7, %c0_8] : memref<32x16xbf16, #tpu.memory_space<vmem>>, vector<32x16xbf16>
    %cst_9 = arith.constant dense<0.000000e+00> : vector<256x16xf32>
    %11 = tpu.matmul %9, %10, %cst_9 {dimension_numbers = #tpu.dot_dimension_numbers<[1], [0], [0], [1], [0, 0, 1, 1], [], []>} : vector<256x32xbf16>, vector<32x16xbf16>, vector<256x16xf32> -> vector<256x16xf32>
    %c0_10 = arith.constant 0 : index
    %c0_11 = arith.constant 0 : index
    %12 = vector.load %arg5[%c0_10, %c0_11] : memref<1x16xf32, #tpu.memory_space<vmem>>, vector<1x16xf32>
    %13 = vector.broadcast %12 : vector<1x16xf32> to vector<256x16xf32>
    %14 = arith.addf %11, %13 : vector<256x16xf32>
    %cst_12 = arith.constant 0.000000e+00 : f32
    %15 = vector.broadcast %cst_12 : f32 to vector<256x16xf32>
    %16 = arith.maximumf %14, %15 : vector<256x16xf32>
    %17 = vector.extract_strided_slice %16 {offsets = [0, 0], sizes = [128, 16], strides = [1, 1]} : vector<256x16xf32> to vector<128x16xf32>
    %18 = vector.extract_strided_slice %16 {offsets = [128, 0], sizes = [128, 16], strides = [1, 1]} : vector<256x16xf32> to vector<128x16xf32>
    %19 = arith.subf %17, %18 : vector<128x16xf32>
    %c0_13 = arith.constant 0 : index
    %c0_14 = arith.constant 0 : index
    %20 = vector.load %arg6[%c0_13, %c0_14] : memref<1x16xbf16, #tpu.memory_space<vmem>>, vector<1x16xbf16>
    %21 = arith.truncf %19 : vector<128x16xf32> to vector<128x16xbf16>
    %cst_15 = arith.constant dense<0.000000e+00> : vector<1x128xf32>
    %22 = tpu.matmul %20, %21, %cst_15 {dimension_numbers = #tpu.dot_dimension_numbers<[1], [1], [0], [0], [0, 0, 1, 0], [], []>} : vector<1x16xbf16>, vector<128x16xbf16>, vector<1x128xf32> -> vector<1x128xf32>
    %c0_16 = arith.constant 0 : index
    %c0_17 = arith.constant 0 : index
    %23 = vector.load %arg7[%c0_16, %c0_17] : memref<1x128xf32, #tpu.memory_space<vmem>>, vector<1x128xf32>
    tpu.vector_store %arg7[%c0_16, %c0_17], %22 {strides = array<i32>} : memref<1x128xf32, #tpu.memory_space<vmem>>, vector<1x128xf32>,
    return
  }
  func.func @transform_0(%arg0: i32) -> (i32, i32, i32) {
    %c0_i32 = arith.constant 0 : i32
    %c0_i32_0 = arith.constant 0 : i32
    %c0_i32_1 = arith.constant 0 : i32
    return %c0_i32, %arg0, %c0_i32_0 : i32, i32, i32
  }
  func.func @transform_1(%arg0: i32) -> (i32, i32) {
    %c0_i32 = arith.constant 0 : i32
    %c0_i32_0 = arith.constant 0 : i32
    %c0_i32_1 = arith.constant 0 : i32
    return %c0_i32, %c0_i32_0 : i32, i32
  }
  func.func @transform_2(%arg0: i32) -> (i32, i32) {
    %c0_i32 = arith.constant 0 : i32
    %c0_i32_0 = arith.constant 0 : i32
    %c0_i32_1 = arith.constant 0 : i32
    return %c0_i32, %c0_i32_0 : i32, i32
  }
  func.func @transform_3(%arg0: i32) -> (i32, i32) {
    %c0_i32 = arith.constant 0 : i32
    %c0_i32_0 = arith.constant 0 : i32
    %c0_i32_1 = arith.constant 0 : i32
    return %c0_i32, %c0_i32_0 : i32, i32
  }
  func.func @transform_4(%arg0: i32) -> (i32, i32) {
    %c0_i32 = arith.constant 0 : i32
    %c0_i32_0 = arith.constant 0 : i32
    %c0_i32_1 = arith.constant 0 : i32
    return %c0_i32, %c0_i32_0 : i32, i32
  }
  func.func @transform_5(%arg0: i32) -> (i32, i32) {
    %c0_i32 = arith.constant 0 : i32
    %c0_i32_0 = arith.constant 0 : i32
    %c0_i32_1 = arith.constant 0 : i32
    return %c0_i32, %c0_i32_0 : i32, i32
  }
  func.func @transform_6(%arg0: i32) -> (i32, i32) {
    %c0_i32 = arith.constant 0 : i32
    %c0_i32_0 = arith.constant 0 : i32
    return %c0_i32, %arg0 : i32, i32
  }
}

</mosaic_0001>

<bundles_post_ra>
// kernel: tpu_custom_call.1
= control target key start
LH: loop header
LB: loop body
LE: loop exit
PB: predicated region body
PF: predicated region fallthrough
CT: control target
= control target key end

     0   :  { %11 = vsyncpa [#allocation4], 0  ;;  %s1915_s0 = inlined_call_operand.vmem [shape: bf16[2,256,32], index: 0, kind: input, shape index: {}]   ;;  %s1916_s1 = inlined_call_operand.vmem [shape: bf16[32,32], index: 1, kind: input, shape index: {}]   ;;  %s1917_s2 = inlined_call_operand.vmem [shape: f32[1,32], index: 2, kind: input, shape index: {}]   ;;  %s1918_s3 = inlined_call_operand.vmem [shape: bf16[32,16], index: 3, kind: input, shape index: {}]   ;;  %s1919_s4 = inlined_call_operand.vmem [shape: f32[1,16], index: 4, kind: input, shape index: {}]   ;;  %s1920_s5 = inlined_call_operand.vmem [shape: bf16[1,16], index: 5, kind: input, shape index: {}]   ;;  %s1921_s6 = inlined_call_operand.hbm [shape: f32[1,256], index: 6, kind: output, shape index: {}]  }
   0x1   :  { %13 = vsyncpa [#allocation4 + $0x1], 0  ;;  %s1609_s21 = smov 0   ;;  %s1611_s22 = smov 0  }
   0x2   :  { %s1613_s23 = smov 0   ;;  %s1615_s24 = smov 0  }
   0x3 LB: > { %s1241_s25 = sadd.s32 4294967295, %s1569_s24   ;;  %s1242_s26 = sadd.s32 4294967294, %s1569_s24   ;;  %s1569_s24 = sphi %s1615_s24, %s1927_s24   ;;  %s1565_s23 = sphi %s1613_s23, %s1926_s23   ;;  %s1561_s22 = sphi %s1611_s22, %s1925_s22   ;;  %s1557_s21 = sphi %s1609_s21, %s1924_s21  }
   0x4   : > { %s1632_s27 = sadd.s32 1, %s1569_s24   ;;  %s26_s28 = sadd.s32 1, %s1565_s23 }
   0x5   : > { %s23_s29 = ssub.s32 %s1569_s24, %s1632_s27  ;;  %p33_p0 = scmp.ne.s32.totalorder %s1565_s23, %s1561_s22 }
   0x6   : > { %p24_p1 = scmp.eq.s32.totalorder %s23_s29, 0  ;;  %p34_p2 = scmp.eq.s32.totalorder %s1569_s24, 0 }
   0x7   : > { %p168_p3 = scmp.eq.s32.totalorder %s1241_s25, 1  ;;  %p173_p4 = scmp.ne.s32.totalorder %s1561_s22, %s1557_s21 }
   0x8   : > { %s1645_s30 = scalar_select %p24_p1, %s1565_s23, %s26_s28  }
   0x9   : > { %p35_p5 = por %p34_p2, %p33_p0  ;;  %p1647_p6 = por %p168_p3, %p33_p0 }
   0xa   : > { %p174_p7 = scmp.eq.s32.totalorder %s1242_s26, 1  ;;  %p1244_p9 = scmp.ge.s32.totalorder %s1569_s24, 2 }
   0xc   : > { %p1651_p8 = por %p174_p7, %p173_p4  ;;  %205 = sbr.rel (%p1244_p9) target bundleno = 31 (0x1f), region = 36 }
  0x13   : > { %208 = sbr.rel (!%p35_p5) target bundleno = 31 (0x1f), region = 40  ;;  %s210_s9 = sand.u32 (%p35_p5), 1, %s1565_s23  }
  0x14   : > { %s1308_s10 = sshll.u32 (%p35_p5), %s1569_s24, 6  ;;  %s1245_s11 = sshll.u32 (%p35_p5), %s210_s9, 7 }
  0x15   : > { %s1663_s14 = scalar_lea.vmem (%p35_p5), %s1915_s0, %s1308_s10  ;;  %s212_s15 = scalar_lea.vmem (%p35_p5), [#allocation2], %s1245_s11 }
  0x16   : > { %v231_v0 = vld [vmem:[%s1663_s14] sm:$0xff] (%p35_p5)   ;;  %v235_v1 = vld [vmem:[%s1663_s14 + $0x8] sm:$0xff] (%p35_p5)   ;;  %v239_v2 = vld [vmem:[%s1663_s14 + $0x10] sm:$0xff] (%p35_p5)  }
  0x17   : > { %232 = vst [vmem:[%s212_s15] sm:$0xff] (%p35_p5), %v231_v0   ;;  %236 = vst [vmem:[%s212_s15 + $0x8] sm:$0xff] (%p35_p5), %v235_v1   ;;  %v243_v3 = vld [vmem:[%s1663_s14 + $0x18] sm:$0xff] (%p35_p5)   ;;  %v247_v4 = vld [vmem:[%s1663_s14 + $0x20] sm:$0xff] (%p35_p5)  }
  0x18   : > { %240 = vst [vmem:[%s212_s15 + $0x10] sm:$0xff] (%p35_p5), %v239_v2   ;;  %v251_v5 = vld [vmem:[%s1663_s14 + $0x28] sm:$0xff] (%p35_p5)   ;;  %244 = vst [vmem:[%s212_s15 + $0x18] sm:$0xff] (%p35_p5), %v243_v3   ;;  %v255_v6 = vld [vmem:[%s1663_s14 + $0x30] sm:$0xff] (%p35_p5)  }
  0x19   : > { %248 = vst [vmem:[%s212_s15 + $0x20] sm:$0xff] (%p35_p5), %v247_v4   ;;  %252 = vst [vmem:[%s212_s15 + $0x28] sm:$0xff] (%p35_p5), %v251_v5   ;;  %v259_v7 = vld [vmem:[%s1663_s14 + $0x38] sm:$0xff] (%p35_p5)   ;;  %v263_v8 = vld [vmem:[%s1663_s14 + $0x80] sm:$0xff] (%p35_p5)  }
  0x1a   : > { %256 = vst [vmem:[%s212_s15 + $0x30] sm:$0xff] %v255_v6   ;;  %260 = vst [vmem:[%s212_s15 + $0x38] sm:$0xff] %v259_v7   ;;  %v267_v9 = vld [vmem:[%s1663_s14 + $0x88] sm:$0xff]   ;;  %v271_v10 = vld [vmem:[%s1663_s14 + $0x90] sm:$0xff]  }
  0x1b   : > { %264 = vst [vmem:[%s212_s15 + $0x40] sm:$0xff] %v263_v8   ;;  %v275_v11 = vld [vmem:[%s1663_s14 + $0x98] sm:$0xff]   ;;  %268 = vst [vmem:[%s212_s15 + $0x48] sm:$0xff] %v267_v9   ;;  %v279_v12 = vld [vmem:[%s1663_s14 + $0xa0] sm:$0xff]  }
  0x1c   : > { %272 = vst [vmem:[%s212_s15 + $0x50] sm:$0xff] %v271_v10   ;;  %276 = vst [vmem:[%s212_s15 + $0x58] sm:$0xff] %v275_v11   ;;  %v283_v13 = vld [vmem:[%s1663_s14 + $0xa8] sm:$0xff]   ;;  %v287_v14 = vld [vmem:[%s1663_s14 + $0xb0] sm:$0xff]  }
  0x1d   : > { %280 = vst [vmem:[%s212_s15 + $0x60] sm:$0xff] %v279_v12   ;;  %284 = vst [vmem:[%s212_s15 + $0x68] sm:$0xff] %v283_v13   ;;  %v291_v15 = vld [vmem:[%s1663_s14 + $0xb8] sm:$0xff]  }
  0x1e   : > { %288 = vst [vmem:[%s212_s15 + $0x70] sm:$0xff] %v287_v14   ;;  %292 = vst [vmem:[%s212_s15 + $0x78] sm:$0xff] %v291_v15  }
  0x1f PF: > { %p1248_p10 = scmp.ge.s32.totalorder %s1569_s24, 1  ;;  %p380_p11 = scmp.lt.s32.totalorder %s1569_s24, 3 }
  0x21   : > { %p381_p12 = pnand %p1248_p10, %p380_p11 }
  0x22   : > { %v1487_v16 = vld [vmem:[%s1916_s1] sm:$0xff] (!%p381_p12)   ;;  %s1687_s18 = sand.u32 (!%p381_p12), 1, %s1561_s22   ;;  %v1488_v17 = vld [vmem:[%s1916_s1 + $0x8] sm:$0xff] (!%p381_p12)   ;;  %vm552_vm0 = vcmask (!%p381_p12), 261120   ;;  %vm1572_vm1 = vmmov (!%p381_p12), 0   ;;  %vm1099_vm2 = vcmask (!%p381_p12), 130048  }
  0x23   : > { %384 = sbr.rel (%p381_p12) target bundleno = 811 (0x32b), region = 81  ;;  %s1249_s26 = sshll.u32 (!%p381_p12), %s1687_s18, 7  ;;  %1354 = vmatprep.subr.bf16.mxu0 (!%p381_p12), %v1487_v16  ;;  %v1505_v34 = vld [vmem:[%s1918_s3] sm:$0xff] (!%p381_p12)   ;;  %v1506_v35 = vld [vmem:[%s1918_s3 + $0x8] sm:$0xff] (!%p381_p12)  }
  0x24   : > { %1355 = vmatpush3.bf16.msra.mxu0 (!%p381_p12), %v1487_v16  ;;  %s1693_s28 = scalar_lea.vmem (!%p381_p12), [#allocation2], %s1249_s26  ;;  %1390 = vmatprep.subr.bf16.mxu1 (!%p381_p12), %v1505_v34  ;;  %v1736_v36 = vld [vmem:[%s1917_s2] ss:$0 sm:$0xff] (!%p381_p12)  ;;  %s414_s19 = scalar_lea.vmem (!%p381_p12), [#allocation3], %s1687_s18 }
  0x25   : > { %v1489_v18 = vld [vmem:[%s1693_s28] sm:$0xff] (!%p381_p12)   ;;  %1356 = vmatprep.subr.bf16.mxu0 (!%p381_p12), %v1488_v17  ;;  %v1490_v19 = vld [vmem:[%s1693_s28 + $0x8] sm:$0xff] (!%p381_p12)   ;;  %v1491_v20 = vld [vmem:[%s1693_s28 + $0x10] sm:$0xff] (!%p381_p12)   ;;  %1391 = vmatpush3.bf16.msra.mxu1 (!%p381_p12), %v1505_v34  ;;  %s1181_s20 = sshll.u32 (!%p381_p12), %s414_s19, 4  ;;  %s1305_s26 = sshll.u32 (!%p381_p12), %s1241_s25, 4  ;;  %s1868_s20 = int_to_ptr.vmem [resolvable:$true] %s1181_s20 }
  0x26   : > { %1358 = vmatprep.mubr.msk.bf16.mxu0 (!%p381_p12), %vm552_vm0, %v1489_v18  ;;  %v1492_v21 = vld [vmem:[%s1693_s28 + $0x18] sm:$0xff] (!%p381_p12)   ;;  %v1493_v22 = vld [vmem:[%s1693_s28 + $0x20] sm:$0xff] (!%p381_p12)   ;;  %v1494_v23 = vld [vmem:[%s1693_s28 + $0x28] sm:$0xff] (!%p381_p12)   ;;  %1392 = vmatprep.subr.bf16.mxu1 (!%p381_p12), %v1506_v35  ;;  %s1873_s9 = scalar_lea.hbm (!%p381_p12), %s1921_s6, %s1305_s26  ;;  %s1169_s10 = scalar_lea.sflag (!%p381_p12), [#allocation4], %s1687_s18 }
  0x27   : > { %v1495_v24 = vld [vmem:[%s1693_s28 + $0x30] sm:$0xff] (!%p381_p12)   ;;  %v1496_v25 = vld [vmem:[%s1693_s28 + $0x38] sm:$0xff] (!%p381_p12)   ;;  %v1497_v26 = vld [vmem:[%s1693_s28 + $0x40] sm:$0xff] (!%p381_p12)   ;;  %s1507_s11 = scalar_lea.vmem (!%p381_p12), %s1868_s20, 16  ;;  %s1573_s25 = smov (!%p381_p12), [#allocation3]  }
  0x28   : > { %1357 = vmatpush3.bf16.msra.mxu0 (!%p381_p12), %v1488_v17  ;;  %v1498_v27 = vld [vmem:[%s1693_s28 + $0x48] sm:$0xff] (!%p381_p12)   ;;  %v1499_v28 = vld [vmem:[%s1693_s28 + $0x50] sm:$0xff] (!%p381_p12)   ;;  %v1500_v29 = vld [vmem:[%s1693_s28 + $0x58] sm:$0xff] (!%p381_p12)   ;;  %p1508_p13 = scmp.ne.s32.totalorder (!%p381_p12), %s1868_s20, %s1507_s11  ;;  %s1511_s12 = sshll.u32 (!%p381_p12), %s1573_s25, 4  ;;  %s1512_s12 = int_to_ptr.vmem [resolvable:$false] %s1511_s12 }
  0x29   : > { %v1501_v30 = vld [vmem:[%s1693_s28 + $0x60] sm:$0xff] (!%p381_p12)   ;;  %v1502_v31 = vld [vmem:[%s1693_s28 + $0x68] sm:$0xff] (!%p381_p12)   ;;  %v1503_v32 = vld [vmem:[%s1693_s28 + $0x70] sm:$0xff] (!%p381_p12)   ;;  %1393 = vmatpush3.bf16.msra.mxu1 (!%p381_p12), %v1506_v35  ;;  %s1513_s13 = scalar_lea.vmem (!%p381_p12), %s1512_s12, 32  ;;  %p1514_p2 = scmp.lt.s32.totalorder (!%p381_p12), %s1868_s20, %s1512_s12 }
  0x2a   : > { %v1504_v33 = vld [vmem:[%s1693_s28 + $0x78] sm:$0xff]   ;;  %p1509_p0 = pnand %p1508_p13, %p1647_p6  ;;  %p1515_p3 = scmp.lt.s32.totalorder %s1513_s13, %s1507_s11 }
  0x2b   : > { %1359 = vmatmul.mubr.msk.bf16.vlgmr.msra.gmra.mrb[0].mxu0 %vm552_vm0, %v1490_v19 }
  0x2c   : > { %1362 = vmatprep.mubr.msk.bf16.mxu0 %vm552_vm0, %v1491_v20  ;;  %p1510_p1 = pneg %p1509_p0  ;;  %p1516_p4 = por %p1515_p3, %p1514_p2 }
  0x2e   : > { %p1517_p5 = pnand %p1516_p4, %p1510_p1 }
  0x33   : > { %1363 = vmatmul.mubr.msk.bf16.gmra.mrb[4].mxu0 %vm552_vm0, %v1492_v21 }
  0x34   : > { %1366 = vmatprep.mubr.msk.bf16.mxu0 %vm552_vm0, %v1493_v22 }
  0x3b   : > { %1367 = vmatmul.mubr.msk.bf16.gmra.mrb[8].mxu0 %vm552_vm0, %v1494_v23 }
  0x3c   : > { %1370 = vmatprep.mubr.msk.bf16.mxu0 %vm552_vm0, %v1495_v24 }
  0x43   : > { %1371 = vmatmul.mubr.msk.bf16.gmra.mrb[12].mxu0 %vm552_vm0, %v1496_v25 }
  0x44   : > { %1374 = vmatprep.mubr.msk.bf16.mxu0 %vm552_vm0, %v1497_v26 }
  0x4b   : > { %1375 = vmatmul.mubr.msk.bf16.gmra.mrb[16].mxu0 %vm552_vm0, %v1498_v27 }
  0x4c   : > { %1378 = vmatprep.mubr.msk.bf16.mxu0 %vm552_vm0, %v1499_v28 }
  0x53   : > { %1379 = vmatmul.mubr.msk.bf16.gmra.mrb[20].mxu0 %vm552_vm0, %v1500_v29 }
  0x54   : > { %1382 = vmatprep.mubr.msk.bf16.mxu0 %vm552_vm0, %v1501_v30 }
  0x5b   : > { %1383 = vmatmul.mubr.msk.bf16.gmra.mrb[24].mxu0 %vm552_vm0, %v1502_v31 }
  0x5c   : > { %1386 = vmatprep.mubr.msk.bf16.mxu0 %vm552_vm0, %v1503_v32 }
  0x63   : > { %1387 = vmatmul.mubr.msk.bf16.gmra.mrb[28].mxu0 %vm552_vm0, %v1504_v33 }
  0xfe   : > { %v1360_v37 = vpop.f32.mrb[0].mxu0 }
  0xff   : > { %v644_v38 = vadd.f32 %v1360_v37, %v1736_v36  ;;  %v635_v39 = vpop.f32.mrb[1].mxu0 }
 0x100   : > { %v636_v40 = vadd.f32 %v1736_v36, %v635_v39  ;;  %v1361_v41 = vpop.f32.mrb[2].mxu0 }
 0x101   : > { %v647_v42 = vadd.f32 %v1361_v41, %v1736_v36  ;;  %v638_v43 = vpop.f32.mrb[3].mxu0  ;;  %v764_v45 = vmax.f32 %v644_v38, 0.0 }
 0x102   : > { %v639_v44 = vadd.f32 %v1736_v36, %v638_v43  ;;  %v762_v47 = vmax.f32 %v636_v40, 0.0 }
 0x103   : > { %v765_v46 = vmax.f32 %v647_v42, 0.0 }
 0x104   : > { %v763_v48 = vmax.f32 %v639_v44, 0.0 }
 0x105   : > { %v795_v49 = vpack.c.bf16 %v765_v46, %v764_v45 }
 0x106   : > { %v1364_v50 = vpop.f32.mrb[4].mxu0  ;;  %v794_v51 = vpack.c.bf16 %v763_v48, %v762_v47 }
 0x107   : > { %v660_v52 = vadd.f32 %v1364_v50, %v1736_v36  ;;  %v651_v53 = vpop.f32.mrb[5].mxu0 }
 0x108   : > { %v652_v54 = vadd.f32 %v1736_v36, %v651_v53  ;;  %v1365_v55 = vpop.f32.mrb[6].mxu0  ;;  %1394 = vmatprep.mubr.msk.bf16.mxu1 %vm552_vm0, %v794_v51 }
 0x109   : > { %v663_v56 = vadd.f32 %v1365_v55, %v1736_v36  ;;  %v654_v57 = vpop.f32.mrb[7].mxu0  ;;  %1395 = vmatmul.mubr.msk.bf16.vlgmr.msra.gmra.mrb[0].mxu1 %vm552_vm0, %v795_v49  ;;  %v768_v59 = vmax.f32 %v660_v52, 0.0 }
 0x10a   : > { %v655_v58 = vadd.f32 %v1736_v36, %v654_v57  ;;  %v766_v61 = vmax.f32 %v652_v54, 0.0 }
 0x10b   : > { %v769_v60 = vmax.f32 %v663_v56, 0.0 }
 0x10c   : > { %v767_v62 = vmax.f32 %v655_v58, 0.0 }
 0x10d   : > { %v797_v63 = vpack.c.bf16 %v769_v60, %v768_v59 }
 0x10e   : > { %v796_v0 = vpack.c.bf16 %v767_v62, %v766_v61  ;;  %v1368_v1 = vpop.f32.mrb[8].mxu0 }
 0x10f   : > { %v676_v2 = vadd.f32 %v1368_v1, %v1736_v36  ;;  %v667_v3 = vpop.f32.mrb[9].mxu0 }
 0x110   : > { %v668_v4 = vadd.f32 %v1736_v36, %v667_v3  ;;  %v1369_v5 = vpop.f32.mrb[10].mxu0  ;;  %1398 = vmatprep.mubr.msk.bf16.mxu1 %vm552_vm0, %v796_v0 }
 0x111   : > { %v679_v6 = vadd.f32 %v1369_v5, %v1736_v36  ;;  %v670_v7 = vpop.f32.mrb[11].mxu0  ;;  %1399 = vmatmul.mubr.msk.bf16.gmra.mrb[4].mxu1 %vm552_vm0, %v797_v63  ;;  %v772_v9 = vmax.f32 %v676_v2, 0.0 }
 0x112   : > { %v671_v8 = vadd.f32 %v1736_v36, %v670_v7  ;;  %v770_v11 = vmax.f32 %v668_v4, 0.0 }
 0x113   : > { %v773_v10 = vmax.f32 %v679_v6, 0.0 }
 0x114   : > { %v771_v12 = vmax.f32 %v671_v8, 0.0 }
 0x115   : > { %v799_v13 = vpack.c.bf16 %v773_v10, %v772_v9 }
 0x116   : > { %v798_v14 = vpack.c.bf16 %v771_v12, %v770_v11  ;;  %v1372_v15 = vpop.f32.mrb[12].mxu0 }
 0x117   : > { %v692_v16 = vadd.f32 %v1372_v15, %v1736_v36  ;;  %v683_v17 = vpop.f32.mrb[13].mxu0 }
 0x118   : > { %v684_v18 = vadd.f32 %v1736_v36, %v683_v17  ;;  %v1373_v19 = vpop.f32.mrb[14].mxu0  ;;  %1402 = vmatprep.mubr.msk.bf16.mxu1 %vm552_vm0, %v798_v14 }
 0x119   : > { %v695_v20 = vadd.f32 %v1373_v19, %v1736_v36  ;;  %v686_v21 = vpop.f32.mrb[15].mxu0  ;;  %1403 = vmatmul.mubr.msk.bf16.gmra.mrb[8].mxu1 %vm552_vm0, %v799_v13  ;;  %v776_v23 = vmax.f32 %v692_v16, 0.0 }
 0x11a   : > { %v687_v22 = vadd.f32 %v1736_v36, %v686_v21  ;;  %v774_v25 = vmax.f32 %v684_v18, 0.0 }
 0x11b   : > { %v777_v24 = vmax.f32 %v695_v20, 0.0 }
 0x11c   : > { %v775_v26 = vmax.f32 %v687_v22, 0.0  ;;  %v1571_v22 = vmov 0.0  }
 0x11d   : > { %v801_v27 = vpack.c.bf16 %v777_v24, %v776_v23  ;;  %1426 = vmatprep.subr.bf16.mxu0 %v1571_v22  ;;  %1442 = vmatprep.mubr.msk.bf16.mxu0 %vm1572_vm1, %v1571_v22 }
 0x11e   : > { %v800_v28 = vpack.c.bf16 %v775_v26, %v774_v25  ;;  %v1376_v29 = vpop.f32.mrb[16].mxu0 }
 0x11f   : > { %v708_v30 = vadd.f32 %v1376_v29, %v1736_v36  ;;  %v699_v31 = vpop.f32.mrb[17].mxu0 }
 0x120   : > { %v700_v32 = vadd.f32 %v1736_v36, %v699_v31  ;;  %v1377_v33 = vpop.f32.mrb[18].mxu0  ;;  %1406 = vmatprep.mubr.msk.bf16.mxu1 %vm552_vm0, %v800_v28 }
 0x121   : > { %v711_v34 = vadd.f32 %v1377_v33, %v1736_v36  ;;  %v702_v35 = vpop.f32.mrb[19].mxu0  ;;  %1407 = vmatmul.mubr.msk.bf16.gmra.mrb[12].mxu1 %vm552_vm0, %v801_v27  ;;  %v780_v38 = vmax.f32 %v708_v30, 0.0 }
 0x122   : > { %v703_v37 = vadd.f32 %v1736_v36, %v702_v35  ;;  %v778_v40 = vmax.f32 %v700_v32, 0.0 }
 0x123   : > { %v781_v39 = vmax.f32 %v711_v34, 0.0 }
 0x124   : > { %v779_v41 = vmax.f32 %v703_v37, 0.0 }
 0x125   : > { %v803_v42 = vpack.c.bf16 %v781_v39, %v780_v38  ;;  %v1803_v39 = vld [vmem:[%s1919_s4] ss:$0 sm:$0xff] }
 0x126   : > { %v802_v43 = vpack.c.bf16 %v779_v41, %v778_v40  ;;  %v1380_v44 = vpop.f32.mrb[20].mxu0 }
 0x127   : > { %v724_v45 = vadd.f32 %v1380_v44, %v1736_v36  ;;  %v715_v46 = vpop.f32.mrb[21].mxu0 }
 0x128   : > { %v716_v47 = vadd.f32 %v1736_v36, %v715_v46  ;;  %v1381_v48 = vpop.f32.mrb[22].mxu0  ;;  %1410 = vmatprep.mubr.msk.bf16.mxu1 %vm552_vm0, %v802_v43 }
 0x129   : > { %v784_v49 = vmax.f32 %v724_v45, 0.0  ;;  %v727_v50 = vadd.f32 %v1381_v48, %v1736_v36  ;;  %v718_v51 = vpop.f32.mrb[23].mxu0  ;;  %1411 = vmatmul.mubr.msk.bf16.gmra.mrb[16].mxu1 %vm552_vm0, %v803_v42 }
 0x12a   : > { %v782_v52 = vmax.f32 %v716_v47, 0.0  ;;  %v719_v53 = vadd.f32 %v1736_v36, %v718_v51 }
 0x12b   : > { %v785_v54 = vmax.f32 %v727_v50, 0.0 }
 0x12c   : > { %v783_v55 = vmax.f32 %v719_v53, 0.0 }
 0x12d   : > { %v805_v56 = vpack.c.bf16 %v785_v54, %v784_v49 }
 0x12e   : > { %v804_v57 = vpack.c.bf16 %v783_v55, %v782_v52  ;;  %v1384_v58 = vpop.f32.mrb[24].mxu0 }
 0x12f   : > { %v740_v59 = vadd.f32 %v1384_v58, %v1736_v36  ;;  %v731_v60 = vpop.f32.mrb[25].mxu0 }
 0x130   : > { %v732_v61 = vadd.f32 %v1736_v36, %v731_v60  ;;  %v1385_v62 = vpop.f32.mrb[26].mxu0  ;;  %1414 = vmatprep.mubr.msk.bf16.mxu1 %vm552_vm0, %v804_v57 }
 0x131   : > { %v788_v63 = vmax.f32 %v740_v59, 0.0  ;;  %v743_v0 = vadd.f32 %v1385_v62, %v1736_v36  ;;  %v734_v1 = vpop.f32.mrb[27].mxu0  ;;  %1415 = vmatmul.mubr.msk.bf16.gmra.mrb[20].mxu1 %vm552_vm0, %v805_v56 }
 0x132   : > { %v786_v2 = vmax.f32 %v732_v61, 0.0  ;;  %v735_v3 = vadd.f32 %v1736_v36, %v734_v1 }
 0x133   : > { %v789_v4 = vmax.f32 %v743_v0, 0.0 }
 0x134   : > { %v787_v5 = vmax.f32 %v735_v3, 0.0 }
 0x135   : > { %v807_v6 = vpack.c.bf16 %v789_v4, %v788_v63 }
 0x136   : > { %v806_v7 = vpack.c.bf16 %v787_v5, %v786_v2  ;;  %v1388_v8 = vpop.f32.mrb[28].mxu0 }
 0x137   : > { %v756_v9 = vadd.f32 %v1388_v8, %v1736_v36  ;;  %v747_v10 = vpop.f32.mrb[29].mxu0 }
 0x138   : > { %v748_v11 = vadd.f32 %v1736_v36, %v747_v10  ;;  %v1389_v12 = vpop.f32.mrb[30].mxu0  ;;  %1418 = vmatprep.mubr.msk.bf16.mxu1 %vm552_vm0, %v806_v7 }
 0x139   : > { %v792_v13 = vmax.f32 %v756_v9, 0.0  ;;  %v759_v14 = vadd.f32 %v1389_v12, %v1736_v36  ;;  %v750_v15 = vpop.f32.mrb[31].mxu0  ;;  %1419 = vmatmul.mubr.msk.bf16.gmra.mrb[24].mxu1 %vm552_vm0, %v807_v6 }
 0x13a   : > { %v790_v16 = vmax.f32 %v748_v11, 0.0  ;;  %v751_v17 = vadd.f32 %v1736_v36, %v750_v15 }
 0x13b   : > { %v793_v18 = vmax.f32 %v759_v14, 0.0 }
 0x13c   : > { %v791_v19 = vmax.f32 %v751_v17, 0.0 }
 0x13d   : > { %v809_v20 = vpack.c.bf16 %v793_v18, %v792_v13 }
 0x13e   : > { %v808_v21 = vpack.c.bf16 %v791_v19, %v790_v16 }
 0x140   : > { %1422 = vmatprep.mubr.msk.bf16.mxu1 %vm552_vm0, %v808_v21 }
 0x141   : > { %1423 = vmatmul.mubr.msk.bf16.gmra.mrb[28].mxu1 %vm552_vm0, %v809_v20 }
 0x1dc   : > { %v1396_v23 = vpop.f32.mrb[0].mxu1 }
 0x1dd   : > { %v915_v24 = vpop.f32.mrb[1].mxu1  ;;  %v924_v40 = vadd.f32 %v1396_v23, %v1803_v39 }
 0x1de   : > { %v1397_v25 = vpop.f32.mrb[2].mxu1  ;;  %v916_v41 = vadd.f32 %v1803_v39, %v915_v24 }
 0x1df   : > { %v918_v26 = vpop.f32.mrb[3].mxu1  ;;  %v927_v43 = vadd.f32 %v1397_v25, %v1803_v39  ;;  %v1044_v49 = vmax.f32 %v924_v40, 0.0 }
 0x1e0   : > { %v919_v46 = vadd.f32 %v1803_v39, %v918_v26  ;;  %v1042_v53 = vmax.f32 %v916_v41, 0.0 }
 0x1e1   : > { %v1045_v56 = vmax.f32 %v927_v43, 0.0 }
 0x1e2   : > { %v1043_v59 = vmax.f32 %v919_v46, 0.0 }
 0x1e4   : > { %v1400_v27 = vpop.f32.mrb[4].mxu1 }
 0x1e5   : > { %v931_v36 = vpop.f32.mrb[5].mxu1  ;;  %v940_v62 = vadd.f32 %v1400_v27, %v1803_v39 }
 0x1e6   : > { %v1401_v28 = vpop.f32.mrb[6].mxu1  ;;  %v932_v0 = vadd.f32 %v1803_v39, %v931_v36 }
 0x1e7   : > { %v934_v29 = vpop.f32.mrb[7].mxu1  ;;  %v943_v3 = vadd.f32 %v1401_v28, %v1803_v39  ;;  %v1048_v11 = vmax.f32 %v940_v62, 0.0 }
 0x1e8   : > { %v935_v7 = vadd.f32 %v1803_v39, %v934_v29  ;;  %v1046_v15 = vmax.f32 %v932_v0, 0.0 }
 0x1e9   : > { %v1049_v19 = vmax.f32 %v943_v3, 0.0 }
 0x1ea   : > { %v1047_v23 = vmax.f32 %v935_v7, 0.0 }
 0x1ec   : > { %v1404_v30 = vpop.f32.mrb[8].mxu1 }
 0x1ed   : > { %v947_v31 = vpop.f32.mrb[9].mxu1  ;;  %v956_v26 = vadd.f32 %v1404_v30, %v1803_v39 }
 0x1ee   : > { %v1788_v32 = vpop.f32.mrb[10].mxu1  ;;  %v948_v36 = vadd.f32 %v1803_v39, %v947_v31 }
 0x1ef   : > { %v1790_v33 = vpop.f32.mrb[11].mxu1  ;;  %v959_v40 = vadd.f32 %v1788_v32, %v1803_v39 }
 0x1f4   : > { %v1792_v34 = vpop.f32.mrb[12].mxu1 }
 0x1f5   : > { %v1794_v35 = vpop.f32.mrb[13].mxu1 }
 0x1f6   : > { %v1796_v37 = vpop.f32.mrb[14].mxu1 }
 0x1f7   : > { %v1798_v38 = vpop.f32.mrb[15].mxu1 }
 0x1f8   : > { %v967_v3 = vadd.f32 %v1803_v39, %v1798_v38 }
 0x1fa   : > { %v1055_v38 = vmax.f32 %v967_v3, 0.0 }
 0x1fc   : > { %v1412_v42 = vpop.f32.mrb[16].mxu1 }
 0x1fd   : > { %v988_v44 = vadd.f32 %v1412_v42, %v1803_v39  ;;  %v979_v45 = vpop.f32.mrb[17].mxu1 }
 0x1fe   : > { %v980_v47 = vadd.f32 %v1803_v39, %v979_v45  ;;  %v1413_v48 = vpop.f32.mrb[18].mxu1 }
 0x1ff   : > { %v1060_v50 = vmax.f32 %v988_v44, 0.0  ;;  %v991_v51 = vadd.f32 %v1413_v48, %v1803_v39  ;;  %v982_v52 = vpop.f32.mrb[19].mxu1  ;;  %v951_v44 = vadd.f32 %v1803_v39, %v1790_v33 }
 0x200   : > { %v1058_v54 = vmax.f32 %v980_v47, 0.0  ;;  %v983_v55 = vadd.f32 %v1803_v39, %v982_v52  ;;  %v1052_v47 = vmax.f32 %v956_v26, 0.0  ;;  %v1090_v26 = vld [vmem:[%s1920_s5] sm:$0x1] }
 0x201   : > { %v1076_v57 = vsub.f32 %v1044_v49, %v1060_v50  ;;  %v1061_v58 = vmax.f32 %v991_v51, 0.0  ;;  %v1050_v50 = vmax.f32 %v948_v36, 0.0  ;;  %v1051_v33 = vmax.f32 %v951_v44, 0.0 }
 0x202   : > { %v1074_v60 = vsub.f32 %v1042_v53, %v1058_v54  ;;  %v1059_v61 = vmax.f32 %v983_v55, 0.0  ;;  %v1053_v53 = vmax.f32 %v959_v40, 0.0 }
 0x203   : > { %v1077_v63 = vsub.f32 %v1045_v56, %v1061_v58  ;;  %v972_v58 = vadd.f32 %v1792_v34, %v1803_v39 }
 0x204   : > { %v1075_v1 = vsub.f32 %v1043_v59, %v1059_v61  ;;  %v1416_v2 = vpop.f32.mrb[20].mxu1 }
 0x205   : > { %v1092_v4 = vpack.c.bf16 %v1077_v63, %v1076_v57  ;;  %v1004_v5 = vadd.f32 %v1416_v2, %v1803_v39  ;;  %v995_v6 = vpop.f32.mrb[21].mxu1  ;;  %v975_v63 = vadd.f32 %v1796_v37, %v1803_v39 }
 0x206   : > { %v1091_v8 = vpack.c.bf16 %v1075_v1, %v1074_v60  ;;  %v996_v9 = vadd.f32 %v1803_v39, %v995_v6  ;;  %v1417_v10 = vpop.f32.mrb[22].mxu1  ;;  %v964_v60 = vadd.f32 %v1803_v39, %v1794_v35  ;;  %v1056_v6 = vmax.f32 %v972_v58, 0.0 }
 0x207   : > { %v1064_v12 = vmax.f32 %v1004_v5, 0.0  ;;  %v1007_v13 = vadd.f32 %v1417_v10, %v1803_v39  ;;  %v998_v14 = vpop.f32.mrb[23].mxu1  ;;  %v1107_v52 = vsel %vm1099_vm2, %v1092_v4, 0 }
 0x208   : > { %v1062_v16 = vmax.f32 %v996_v9, 0.0  ;;  %v999_v17 = vadd.f32 %v1803_v39, %v998_v14  ;;  %v1104_v18 = vsel %vm1099_vm2, %v1091_v8, 0  ;;  %v1054_v9 = vmax.f32 %v964_v60, 0.0 }
 0x209   : > { %v1822_v20 = vsub.f32 %v1048_v11, %v1064_v12  ;;  %v1065_v21 = vmax.f32 %v1007_v13, 0.0  ;;  %1427 = vmatpush3.bf16.xpose.msra.mxu0 %v1104_v18  ;;  %v1057_v12 = vmax.f32 %v975_v63, 0.0 }
 0x20a   : > { %v1078_v24 = vsub.f32 %v1046_v15, %v1062_v16  ;;  %v1063_v25 = vmax.f32 %v999_v17, 0.0  ;;  %1428 = vmatprep.subr.bf16.mxu0 %v1571_v22 }
 0x20b   : > { %v1081_v27 = vsub.f32 %v1049_v19, %v1065_v21 }
 0x20c   : > { %v1079_v28 = vsub.f32 %v1047_v23, %v1063_v25  ;;  %v1420_v29 = vpop.f32.mrb[24].mxu1 }
 0x20d   : > { %v1094_v41 = vpack.c.bf16 %v1081_v27, %v1822_v20  ;;  %v1020_v42 = vadd.f32 %v1420_v29, %v1803_v39  ;;  %v1011_v43 = vpop.f32.mrb[25].mxu1 }
 0x20e   : > { %v1093_v45 = vpack.c.bf16 %v1079_v28, %v1078_v24  ;;  %v1012_v46 = vadd.f32 %v1803_v39, %v1011_v43  ;;  %v1421_v30 = vpop.f32.mrb[26].mxu1 }
 0x20f   : > { %v1068_v48 = vmax.f32 %v1020_v42, 0.0  ;;  %v1023_v31 = vadd.f32 %v1421_v30, %v1803_v39  ;;  %v1014_v49 = vpop.f32.mrb[27].mxu1  ;;  %v1113_v21 = vsel %vm1099_vm2, %v1094_v41, 0 }
 0x210   : > { %v1066_v51 = vmax.f32 %v1012_v46, 0.0  ;;  %v1015_v32 = vadd.f32 %v1803_v39, %v1014_v49  ;;  %v1110_v11 = vsel %vm1099_vm2, %v1093_v45, 0 }
 0x211   : > { %v1084_v54 = vsub.f32 %v1052_v47, %v1068_v48  ;;  %v1069_v55 = vmax.f32 %v1023_v31, 0.0  ;;  %1429 = vmatpush3.bf16.xpose.msra.mxu0 %v1107_v52 }
 0x212   : > { %v1082_v56 = vsub.f32 %v1050_v50, %v1066_v51  ;;  %v1067_v57 = vmax.f32 %v1015_v32, 0.0  ;;  %1430 = vmatprep.subr.bf16.mxu0 %v1571_v22 }
 0x213   : > { %v1085_v59 = vsub.f32 %v1053_v53, %v1069_v55 }
 0x214   : > { %v1083_v61 = vsub.f32 %v1051_v33, %v1067_v57  ;;  %v1424_v62 = vpop.f32.mrb[28].mxu1 }
 0x215   : > { %v1096_v0 = vpack.c.bf16 %v1085_v59, %v1084_v54  ;;  %v1036_v1 = vadd.f32 %v1424_v62, %v1803_v39  ;;  %v1027_v2 = vpop.f32.mrb[29].mxu1 }
 0x216   : > { %v1095_v4 = vpack.c.bf16 %v1083_v61, %v1082_v56  ;;  %v1028_v5 = vadd.f32 %v1803_v39, %v1027_v2  ;;  %v1425_v34 = vpop.f32.mrb[30].mxu1 }
 0x217   : > { %v1072_v7 = vmax.f32 %v1036_v1, 0.0  ;;  %v1039_v35 = vadd.f32 %v1425_v34, %v1803_v39  ;;  %v1030_v8 = vpop.f32.mrb[31].mxu1  ;;  %v1119_v23 = vsel %vm1099_vm2, %v1096_v0, 0 }
 0x218   : > { %v1070_v10 = vmax.f32 %v1028_v5, 0.0  ;;  %v1031_v37 = vadd.f32 %v1803_v39, %v1030_v8  ;;  %v1116_v39 = vsel %vm1099_vm2, %v1095_v4, 0 }
 0x219   : > { %v1088_v13 = vsub.f32 %v1056_v6, %v1072_v7  ;;  %v1073_v14 = vmax.f32 %v1039_v35, 0.0  ;;  %1431 = vmatpush3.bf16.xpose.msra.mxu0 %v1110_v11 }
 0x21a   : > { %v1086_v15 = vsub.f32 %v1054_v9, %v1070_v10  ;;  %v1071_v16 = vmax.f32 %v1031_v37, 0.0  ;;  %1432 = vmatprep.subr.bf16.mxu0 %v1571_v22 }
 0x21b   : > { %v1089_v17 = vsub.f32 %v1057_v12, %v1073_v14 }
 0x21c   : > { %v1087_v18 = vsub.f32 %v1055_v38, %v1071_v16 }
 0x21d   : > { %v1098_v19 = vpack.c.bf16 %v1089_v17, %v1088_v13 }
 0x21e   : > { %v1097_v20 = vpack.c.bf16 %v1087_v18, %v1086_v15 }
 0x21f   : > { %v1125_v25 = vsel %vm1099_vm2, %v1098_v19, 0 }
 0x220   : > { %v1122_v24 = vsel %vm1099_vm2, %v1097_v20, 0 }
 0x221   : > { %1433 = vmatpush3.bf16.xpose.msra.mxu0 %v1113_v21 }
 0x222   : > { %1434 = vmatprep.subr.bf16.mxu0 %v1571_v22 }
 0x229   : > { %1435 = vmatpush3.bf16.xpose.msra.mxu0 %v1116_v39 }
 0x22a   : > { %1436 = vmatprep.subr.bf16.mxu0 %v1571_v22 }
 0x231   : > { %1437 = vmatpush3.bf16.xpose.msra.mxu0 %v1119_v23 }
 0x232   : > { %1438 = vmatprep.subr.bf16.mxu0 %v1571_v22 }
 0x239   : > { %1439 = vmatpush3.bf16.xpose.msra.mxu0 %v1122_v24 }
 0x23a   : > { %1440 = vmatprep.subr.bf16.mxu0 %v1571_v22 }
 0x241   : > { %1441 = vmatpush3.bf16.xpose.msra.mxu0 %v1125_v25 }
 0x248   : > { %1443 = vmatmul.mubr.msk.bf16.vlgmr.msra.gmra.mrb[32].mxu0 %vm1099_vm2, %v1090_v26 }
 0x31b   : > { %v1161_v22 = vpop.f32.mrb[32].mxu0 }
 0x31c   : > { %1167 = vst [vmem:[%s414_s19] sm:$0x1] %v1161_v22  ;;  %v1444_v27 = vpop.f32.mrb[33].mxu0 }
 0x31d   : > { %v1164_v36 = vpop.f32.mrb[34].mxu0 }
 0x31e   : > { %1520 = shalt.err (!%p1517_p5)
}
 0x31f   : > { %s1521_s18 = scalar_lea.hbm %s1873_s9, 16  ;;  %s1525_s16 = scalar_lea.hbm %s1921_s6, 32 }
 0x320   : > { %p1522_p7 = scmp.ne.s32.totalorder %s1873_s9, %s1521_s18  ;;  %p1526_p12 = scmp.lt.u32.totalorder %s1873_s9, %s1921_s6 }
 0x321   : > { %p1527_p13 = scmp.lt.u32.totalorder %s1525_s16, %s1521_s18  ;;  %p1529_p1 = scmp.lt.u32.totalorder %s1521_s18, %s1873_s9 }
 0x322   : > { %p1523_p10 = pnand %p1522_p7, %p1647_p6 }
 0x323   : > { %p1528_p0 = por %p1527_p13, %p1526_p12 }
 0x324   : > { %p1524_p11 = pneg %p1523_p10 }
 0x325   : > { %p1530_p2 = por %p1529_p1, %p1528_p0 }
 0x327   : > { %p1531_p3 = pnand %p1530_p2, %p1524_p11 }
 0x329   : > { %1534 = shalt.err (!%p1531_p3)
}
 0x32a   : > { %1446 = dma.vmem_to_hbm [thread:$0]  (%p1647_p6), %s1868_s20, 16, %s1873_s9, %s1169_s10   ;;  %v1445_v28 = vpop.f32.mrb[35].mxu0 }
 0x32b PF: > { %s1193_s26 = sand.u32 1, %s1557_s21   ;;  %p1449_p4 = pnand %p1244_p9, %p1651_p8 }
 0x32c   : > { %s1194_s28 = scalar_lea.sflag [#allocation4], %s1193_s26 }
 0x32d   : > { %1552 = dma.done.wait (!%p1449_p4), %s1194_s28, 16  }
 0x32e   : > { %1554 = vsyncadd (!%p1449_p4), %s1194_s28, 4294967280  ;;  %p16_p5 = scmp.ge.s32.totalorder %s1632_s27, 4   ;;  %s1924_s21 = smov %s1561_s22 }
 0x32f   : > { %s1925_s22 = smov %s1565_s23  ;;  %s1926_s23 = smov %s1645_s30 }
 0x330   : > { %s1927_s24 = smov %s1632_s27  ;;  %18 = sbr.rel (!%p16_p5) target bundleno = 3 (0x3), region = 125 }
 0x337   :  { %1198 = vsyncpa [#allocation4], 1 }
 0x338   :  { %1200 = vsyncpa [#allocation4 + $0x1], 1 }

</bundles_post_ra>
